<compile_context>
chip_gen: v7x
topology: tpu7x:2x2x1
jax: 0.10.0
libtpu: 0.0.40
codegen_flags: <defaults>
</compile_context>

<pallas_src>
import jax
import jax.numpy as jnp
from jax.experimental import pallas as pl
from jax.experimental.pallas import tpu as pltpu

NUM_GROUPS = 4                  # GroupNorm(4, 2C)
GROUPS_PER_HALF = NUM_GROUPS // 2
KH = KW = 4
EPS = 1e-5


def init_layer_kernel(x_ref, wa_ref, wb_ref, ga_ref, ba_ref, gb_ref, bb_ref, o_ref):
    """One grid step = one GroupNorm group of the GLU 'a' half paired with the
    corresponding group of the 'b' half.

      x_ref:            (B, nz)      bf16 noise
      wa_ref / wb_ref:  (nz, gsize)  bf16 weight columns for group g of each half
      ga/ba/gb/bb_ref:  (1, gsize)   f32 GroupNorm affine, broadcast over the 4x4 spatial
      o_ref:            (B, gsize)   f32 output block (lane-dense)
    """
    x = x_ref[...]

    # ConvTranspose2d on a 1x1 input == matmul: bf16 operands, f32 accumulation (MXU).
    ya = jnp.dot(x, wa_ref[...], preferred_element_type=jnp.float32)   # (B, gsize) f32
    yb = jnp.dot(x, wb_ref[...], preferred_element_type=jnp.float32)   # (B, gsize) f32

    def group_norm(y, gamma, beta):
        # Single-pass mean / variance (E[x^2] - E[x]^2), all f32, reduction over lanes.
        inv_n = 1.0 / y.shape[-1]
        m = jnp.sum(y, axis=-1, keepdims=True) * inv_n
        v = jnp.sum(y * y, axis=-1, keepdims=True) * inv_n - m * m
        v = jnp.maximum(v, 0.0)                    # guard tiny negatives from cancellation
        return (y - m) * jax.lax.rsqrt(v + EPS) * gamma + beta

    a = group_norm(ya, ga_ref[...], ba_ref[...])
    b = group_norm(yb, gb_ref[...], bb_ref[...])

    # GLU over channels: a * sigmoid(b).  Output store is a full lane-dense block.
    o_ref[...] = (a * jax.nn.sigmoid(b)).astype(o_ref.dtype)


def spectral_normalize(weight, key, n_iter=3):
    """Spectral norm of a ConvTranspose2d weight (nz, 2C, 4, 4), dim=1 (PyTorch default
    for ConvTranspose2d): power iteration on W viewed as (2C, nz*4*4)."""
    # TODO(synk): PyTorch keeps a persistent `u` buffer with 1 iteration/step; here we
    # re-estimate sigma per call from a fixed random u (wrapper-side, outside the kernel).
    nz, co, kh, kw = weight.shape
    w_mat = jnp.transpose(weight, (1, 0, 2, 3)).reshape(co, nz * kh * kw)
    u = jax.random.normal(key, (co,), dtype=jnp.float32)
    u = u / (jnp.linalg.norm(u) + 1e-12)
    for _ in range(n_iter):
        v = w_mat.T @ u
        v = v / (jnp.linalg.norm(v) + 1e-12)
        u = w_mat @ v
        u = u / (jnp.linalg.norm(u) + 1e-12)
    sigma = u @ (w_mat @ v)
    return weight / sigma


def init_layer_forward(noise, weight_sn, gamma, beta):
    """noise: (B, nz); weight_sn: (nz, 2C, 4, 4); gamma/beta: (2C,). Returns (B, C, 4, 4)."""
    B, nz = noise.shape
    _, two_c, kh, kw = weight_sn.shape
    assert two_c % NUM_GROUPS == 0 and two_c % 2 == 0
    C = two_c // 2
    Fh = C * kh * kw                    # flattened width of each GLU half
    gsize = Fh // GROUPS_PER_HALF       # lanes per GroupNorm group (one grid block)

    # TODO(synk): pad channels (with masked group stats) when C % 16 != 0; the lane-tiled
    # BlockSpecs below require gsize to be a multiple of 128.
    assert gsize % 128 == 0, f"gsize={gsize} must be a multiple of 128 (need C % 16 == 0)"

    # Flatten (nz, 2C, 4, 4) -> (nz, 2C*16) channel-major/spatial-minor, split into the two
    # GLU halves so every kernel intermediate stays lane-dense.  Groups 0..1 are the a-half,
    # groups 2..3 the b-half, so per-block group stats remain exact.
    w_flat = weight_sn.reshape(nz, two_c * kh * kw)
    wa = w_flat[:, :Fh].astype(jnp.bfloat16)
    wb = w_flat[:, Fh:].astype(jnp.bfloat16)
    ga = jnp.repeat(gamma[:C], kh * kw).reshape(1, Fh).astype(jnp.float32)
    gb = jnp.repeat(gamma[C:], kh * kw).reshape(1, Fh).astype(jnp.float32)
    ba = jnp.repeat(beta[:C], kh * kw).reshape(1, Fh).astype(jnp.float32)
    bb = jnp.repeat(beta[C:], kh * kw).reshape(1, Fh).astype(jnp.float32)

    out_flat = pl.pallas_call(
        init_layer_kernel,
        out_shape=jax.ShapeDtypeStruct((B, Fh), jnp.float32),
        grid=(GROUPS_PER_HALF,),
        in_specs=[
            pl.BlockSpec((B, nz), lambda g: (0, 0)),        # noise (reused every step)
            pl.BlockSpec((nz, gsize), lambda g: (0, g)),    # W_a columns of group g
            pl.BlockSpec((nz, gsize), lambda g: (0, g)),    # W_b columns of group g
            pl.BlockSpec((1, gsize), lambda g: (0, g)),     # gamma_a
            pl.BlockSpec((1, gsize), lambda g: (0, g)),     # beta_a
            pl.BlockSpec((1, gsize), lambda g: (0, g)),     # gamma_b
            pl.BlockSpec((1, gsize), lambda g: (0, g)),     # beta_b
        ],
        out_specs=pl.BlockSpec((B, gsize), lambda g: (0, g)),
        compiler_params=pltpu.CompilerParams(
            dimension_semantics=("parallel",),              # megacore-shardable on v7x
        ),
    )(noise.astype(jnp.bfloat16), wa, wb, ga, ba, gb, bb)

    return out_flat.reshape(B, C, kh, kw)


def reference_forward(noise, weight_sn, gamma, beta, matmul_dtype=jnp.float32):
    """Pure-JAX reference mirroring the PyTorch forward (for verification).
    matmul_dtype lets us also check against a bf16-operand matmul (kernel's dtype choice)."""
    B, nz = noise.shape
    _, two_c, kh, kw = weight_sn.shape
    C = two_c // 2
    y = jnp.einsum(
        "bi,iohw->bohw",
        noise.astype(matmul_dtype), weight_sn.astype(matmul_dtype),
        preferred_element_type=jnp.float32,
    )
    yg = y.reshape(B, NUM_GROUPS, (two_c // NUM_GROUPS) * kh * kw)
    mean = jnp.mean(yg, axis=-1, keepdims=True)
    var = jnp.mean((yg - mean) ** 2, axis=-1, keepdims=True)
    yn = ((yg - mean) / jnp.sqrt(var + EPS)).reshape(B, two_c, kh, kw)
    yn = yn * gamma[None, :, None, None] + beta[None, :, None, None]
    return yn[:, :C] * jax.nn.sigmoid(yn[:, C:])


if __name__ == "__main__":
    key = jax.random.PRNGKey(0)
    k_noise, k_w, k_u, k_g, k_b = jax.random.split(key, 5)

    B, nz, channel = 2, 32, 16          # small shapes; output (2, 16, 4, 4)
    two_c = channel * 2

    noise = jax.random.normal(k_noise, (B, nz), dtype=jnp.float32)
    weight = 0.05 * jax.random.normal(k_w, (nz, two_c, KH, KW), dtype=jnp.float32)
    weight_sn = spectral_normalize(weight, k_u, n_iter=3)
    # Non-trivial affine to actually exercise the gamma/beta path.
    gamma = 1.0 + 0.1 * jax.random.normal(k_g, (two_c,), dtype=jnp.float32)
    beta = 0.1 * jax.random.normal(k_b, (two_c,), dtype=jnp.float32)

    out = init_layer_forward(noise, weight_sn, gamma, beta)
    out = jax.block_until_ready(out)
    assert out.shape == (B, channel, KH, KW), out.shape

    # Tight check against a reference that uses the same bf16 matmul operands (verifies
    # the fused GroupNorm/GLU logic), plus a looser check against the pure-f32 PyTorch
    # semantics (bounds the bf16-weight quantization error).
    ref_bf16 = reference_forward(noise, weight_sn, gamma, beta, matmul_dtype=jnp.bfloat16)
    ref_f32 = reference_forward(noise, weight_sn, gamma, beta, matmul_dtype=jnp.float32)
    assert jnp.allclose(out, ref_bf16, rtol=1e-3, atol=1e-3), "mismatch vs bf16-matmul reference"
    assert jnp.allclose(out, ref_f32, rtol=5e-2, atol=2e-2), "mismatch vs f32 reference"

    print("KERNEL_OK")
</pallas_src>

<mosaic_0001>
module attributes {stable_mosaic.version = 11 : i64} {
  func.func @init_layer_kernel(%arg0: i32, %arg1: memref<2x32xbf16, #tpu.memory_space<vmem>>, %arg2: memref<32x128xbf16, #tpu.memory_space<vmem>>, %arg3: memref<32x128xbf16, #tpu.memory_space<vmem>>, %arg4: memref<1x128xf32, #tpu.memory_space<vmem>>, %arg5: memref<1x128xf32, #tpu.memory_space<vmem>>, %arg6: memref<1x128xf32, #tpu.memory_space<vmem>>, %arg7: memref<1x128xf32, #tpu.memory_space<vmem>>, %arg8: memref<2x128xf32, #tpu.memory_space<vmem>>) attributes {dimension_semantics = [#tpu.dimension_semantics<parallel>], iteration_bounds = array<i64: 2>, scalar_prefetch = 0 : i64, scratch_operands = 0 : i64, tpu.core_type = #tpu.core_type<tc>, window_params = [{pipeline_mode = #tpu.pipeline_mode<synchronous>, transform_indices = @transform_0, window_bounds = array<i64: 2, 32>}, {transform_indices = @transform_1, window_bounds = array<i64: 32, 128>}, {transform_indices = @transform_2, window_bounds = array<i64: 32, 128>}, {transform_indices = @transform_3, window_bounds = array<i64: 1, 128>}, {transform_indices = @transform_4, window_bounds = array<i64: 1, 128>}, {transform_indices = @transform_5, window_bounds = array<i64: 1, 128>}, {transform_indices = @transform_6, window_bounds = array<i64: 1, 128>}, {transform_indices = @transform_7, window_bounds = array<i64: 2, 128>}]} {
    %c0 = arith.constant 0 : index
    %c0_0 = arith.constant 0 : index
    %0 = vector.load %arg1[%c0, %c0_0] : memref<2x32xbf16, #tpu.memory_space<vmem>>, vector<2x32xbf16>
    %c0_1 = arith.constant 0 : index
    %c0_2 = arith.constant 0 : index
    %1 = vector.load %arg2[%c0_1, %c0_2] : memref<32x128xbf16, #tpu.memory_space<vmem>>, vector<32x128xbf16>
    %cst = arith.constant dense<0.000000e+00> : vector<2x128xf32>
    %2 = tpu.matmul %0, %1, %cst {dimension_numbers = #tpu.dot_dimension_numbers<[1], [0], [0], [1], [0, 0, 1, 1], [], []>} : vector<2x32xbf16>, vector<32x128xbf16>, vector<2x128xf32> -> vector<2x128xf32>
    %c0_3 = arith.constant 0 : index
    %c0_4 = arith.constant 0 : index
    %3 = vector.load %arg3[%c0_3, %c0_4] : memref<32x128xbf16, #tpu.memory_space<vmem>>, vector<32x128xbf16>
    %cst_5 = arith.constant dense<0.000000e+00> : vector<2x128xf32>
    %4 = tpu.matmul %0, %3, %cst_5 {dimension_numbers = #tpu.dot_dimension_numbers<[1], [0], [0], [1], [0, 0, 1, 1], [], []>} : vector<2x32xbf16>, vector<32x128xbf16>, vector<2x128xf32> -> vector<2x128xf32>
    %c0_6 = arith.constant 0 : index
    %c0_7 = arith.constant 0 : index
    %5 = vector.load %arg4[%c0_6, %c0_7] : memref<1x128xf32, #tpu.memory_space<vmem>>, vector<1x128xf32>
    %c0_8 = arith.constant 0 : index
    %c0_9 = arith.constant 0 : index
    %6 = vector.load %arg5[%c0_8, %c0_9] : memref<1x128xf32, #tpu.memory_space<vmem>>, vector<1x128xf32>
    %cst_10 = arith.constant dense<0.000000e+00> : vector<2xf32>
    %7 = vector.multi_reduction <add>, %2, %cst_10 [1] : vector<2x128xf32> to vector<2xf32>
    %8 = vector.shape_cast %7 : vector<2xf32> to vector<2x1xf32>
    %cst_11 = arith.constant 7.812500e-03 : f32
    %9 = vector.broadcast %cst_11 : f32 to vector<2x1xf32>
    %10 = arith.mulf %8, %9 : vector<2x1xf32>
    %11 = arith.mulf %2, %2 : vector<2x128xf32>
    %cst_12 = arith.constant dense<0.000000e+00> : vector<2xf32>
    %12 = vector.multi_reduction <add>, %11, %cst_12 [1] : vector<2x128xf32> to vector<2xf32>
    %13 = vector.shape_cast %12 : vector<2xf32> to vector<2x1xf32>
    %cst_13 = arith.constant 7.812500e-03 : f32
    %14 = vector.broadcast %cst_13 : f32 to vector<2x1xf32>
    %15 = arith.mulf %13, %14 : vector<2x1xf32>
    %16 = arith.mulf %10, %10 : vector<2x1xf32>
    %17 = arith.subf %15, %16 : vector<2x1xf32>
    %cst_14 = arith.constant 0.000000e+00 : f32
    %18 = vector.broadcast %cst_14 : f32 to vector<2x1xf32>
    %19 = arith.maximumf %17, %18 : vector<2x1xf32>
    %20 = vector.broadcast %10 : vector<2x1xf32> to vector<2x128xf32>
    %21 = arith.subf %2, %20 : vector<2x128xf32>
    %cst_15 = arith.constant 9.99999974E-6 : f32
    %22 = vector.broadcast %cst_15 : f32 to vector<2x1xf32>
    %23 = arith.addf %19, %22 : vector<2x1xf32>
    %24 = math.rsqrt %23 : vector<2x1xf32>
    %25 = vector.broadcast %24 : vector<2x1xf32> to vector<2x128xf32>
    %26 = arith.mulf %21, %25 : vector<2x128xf32>
    %27 = vector.broadcast %5 : vector<1x128xf32> to vector<2x128xf32>
    %28 = arith.mulf %26, %27 : vector<2x128xf32>
    %29 = vector.broadcast %6 : vector<1x128xf32> to vector<2x128xf32>
    %30 = arith.addf %28, %29 : vector<2x128xf32>
    %c0_16 = arith.constant 0 : index
    %c0_17 = arith.constant 0 : index
    %31 = vector.load %arg6[%c0_16, %c0_17] : memref<1x128xf32, #tpu.memory_space<vmem>>, vector<1x128xf32>
    %c0_18 = arith.constant 0 : index
    %c0_19 = arith.constant 0 : index
    %32 = vector.load %arg7[%c0_18, %c0_19] : memref<1x128xf32, #tpu.memory_space<vmem>>, vector<1x128xf32>
    %cst_20 = arith.constant dense<0.000000e+00> : vector<2xf32>
    %33 = vector.multi_reduction <add>, %4, %cst_20 [1] : vector<2x128xf32> to vector<2xf32>
    %34 = vector.shape_cast %33 : vector<2xf32> to vector<2x1xf32>
    %cst_21 = arith.constant 7.812500e-03 : f32
    %35 = vector.broadcast %cst_21 : f32 to vector<2x1xf32>
    %36 = arith.mulf %34, %35 : vector<2x1xf32>
    %37 = arith.mulf %4, %4 : vector<2x128xf32>
    %cst_22 = arith.constant dense<0.000000e+00> : vector<2xf32>
    %38 = vector.multi_reduction <add>, %37, %cst_22 [1] : vector<2x128xf32> to vector<2xf32>
    %39 = vector.shape_cast %38 : vector<2xf32> to vector<2x1xf32>
    %cst_23 = arith.constant 7.812500e-03 : f32
    %40 = vector.broadcast %cst_23 : f32 to vector<2x1xf32>
    %41 = arith.mulf %39, %40 : vector<2x1xf32>
    %42 = arith.mulf %36, %36 : vector<2x1xf32>
    %43 = arith.subf %41, %42 : vector<2x1xf32>
    %cst_24 = arith.constant 0.000000e+00 : f32
    %44 = vector.broadcast %cst_24 : f32 to vector<2x1xf32>
    %45 = arith.maximumf %43, %44 : vector<2x1xf32>
    %46 = vector.broadcast %36 : vector<2x1xf32> to vector<2x128xf32>
    %47 = arith.subf %4, %46 : vector<2x128xf32>
    %cst_25 = arith.constant 9.99999974E-6 : f32
    %48 = vector.broadcast %cst_25 : f32 to vector<2x1xf32>
    %49 = arith.addf %45, %48 : vector<2x1xf32>
    %50 = math.rsqrt %49 : vector<2x1xf32>
    %51 = vector.broadcast %50 : vector<2x1xf32> to vector<2x128xf32>
    %52 = arith.mulf %47, %51 : vector<2x128xf32>
    %53 = vector.broadcast %31 : vector<1x128xf32> to vector<2x128xf32>
    %54 = arith.mulf %52, %53 : vector<2x128xf32>
    %55 = vector.broadcast %32 : vector<1x128xf32> to vector<2x128xf32>
    %56 = arith.addf %54, %55 : vector<2x128xf32>
    %57 = arith.negf %56 : vector<2x128xf32>
    %58 = math.exp %57 : vector<2x128xf32>
    %cst_26 = arith.constant 1.000000e+00 : f32
    %59 = vector.broadcast %cst_26 : f32 to vector<2x128xf32>
    %60 = arith.addf %59, %58 : vector<2x128xf32>
    %61 = arith.divf %59, %60 : vector<2x128xf32>
    %62 = arith.mulf %30, %61 : vector<2x128xf32>
    %c0_27 = arith.constant 0 : index
    %c0_28 = arith.constant 0 : index
    %63 = vector.load %arg8[%c0_27, %c0_28] : memref<2x128xf32, #tpu.memory_space<vmem>>, vector<2x128xf32>
    tpu.vector_store %arg8[%c0_27, %c0_28], %62 {strides = array<i32>} : memref<2x128xf32, #tpu.memory_space<vmem>>, vector<2x128xf32>,
    return
  }
  func.func @transform_0(%arg0: i32) -> (i32, i32) {
    %c0_i32 = arith.constant 0 : i32
    %c0_i32_0 = arith.constant 0 : i32
    %c0_i32_1 = arith.constant 0 : i32
    return %c0_i32, %c0_i32_0 : i32, i32
  }
  func.func @transform_1(%arg0: i32) -> (i32, i32) {
    %c0_i32 = arith.constant 0 : i32
    %c0_i32_0 = arith.constant 0 : i32
    return %c0_i32, %arg0 : i32, i32
  }
  func.func @transform_2(%arg0: i32) -> (i32, i32) {
    %c0_i32 = arith.constant 0 : i32
    %c0_i32_0 = arith.constant 0 : i32
    return %c0_i32, %arg0 : i32, i32
  }
  func.func @transform_3(%arg0: i32) -> (i32, i32) {
    %c0_i32 = arith.constant 0 : i32
    %c0_i32_0 = arith.constant 0 : i32
    return %c0_i32, %arg0 : i32, i32
  }
  func.func @transform_4(%arg0: i32) -> (i32, i32) {
    %c0_i32 = arith.constant 0 : i32
    %c0_i32_0 = arith.constant 0 : i32
    return %c0_i32, %arg0 : i32, i32
  }
  func.func @transform_5(%arg0: i32) -> (i32, i32) {
    %c0_i32 = arith.constant 0 : i32
    %c0_i32_0 = arith.constant 0 : i32
    return %c0_i32, %arg0 : i32, i32
  }
  func.func @transform_6(%arg0: i32) -> (i32, i32) {
    %c0_i32 = arith.constant 0 : i32
    %c0_i32_0 = arith.constant 0 : i32
    return %c0_i32, %arg0 : i32, i32
  }
  func.func @transform_7(%arg0: i32) -> (i32, i32) {
    %c0_i32 = arith.constant 0 : i32
    %c0_i32_0 = arith.constant 0 : i32
    return %c0_i32, %arg0 : i32, i32
  }
}

</mosaic_0001>

<bundles_post_ra>
// kernel: tpu_custom_call.1
= control target key start
LH: loop header
LB: loop body
LE: loop exit
PB: predicated region body
PF: predicated region fallthrough
CT: control target
= control target key end

     0   :  { %s1355_s0 = inlined_call_operand.hbm [shape: bf16[2,32], index: 0, kind: input, shape index: {}]   ;;  %s1356_s1 = inlined_call_operand.hbm [shape: bf16[32,256], index: 1, kind: input, shape index: {}]   ;;  %s1357_s2 = inlined_call_operand.hbm [shape: bf16[32,256], index: 2, kind: input, shape index: {}]   ;;  %s1358_s3 = inlined_call_operand.vmem [shape: f32[1,256], index: 3, kind: input, shape index: {}]   ;;  %s1359_s4 = inlined_call_operand.vmem [shape: f32[1,256], index: 4, kind: input, shape index: {}]   ;;  %s1360_s5 = inlined_call_operand.vmem [shape: f32[1,256], index: 5, kind: input, shape index: {}]   ;;  %s1361_s6 = inlined_call_operand.vmem [shape: f32[1,256], index: 6, kind: input, shape index: {}]   ;;  %s1362_s7 = inlined_call_operand.hbm [shape: f32[2,256], index: 7, kind: output, shape index: {}]  }
   0x1   :  { %1370 = sst [smem:[#allocation12_spill]] %s1356_s1 }
   0x2   :  { %12 = vsyncpa [#allocation3], 0 }
   0x3   :  { %13 = vsyncpa [#allocation6], 0 }
   0x4   :  { %15 = vsyncpa [#allocation6 + $0x1], 0 }
   0x5   :  { %16 = vsyncpa [#allocation4], 0 }
   0x6   :  { %18 = vsyncpa [#allocation4 + $0x1], 0  ;;  %s1082_s24 = smov 0   ;;  %s1084_s25 = smov 0  }
   0x7   :  { %s1086_s26 = smov 0   ;;  %s1088_s27 = smov 0  }
   0x8 LB: > { %s1103_s28 = sadd.s32 1, %s1031_s27   ;;  %s52_s29 = sadd.s32 1, %s1027_s26  ;;  %s1031_s27 = sphi %s1088_s27, %s1393_s27   ;;  %s1027_s26 = sphi %s1086_s26, %s1392_s26   ;;  %s1023_s25 = sphi %s1084_s25, %s1391_s25   ;;  %s1019_s24 = sphi %s1082_s24, %s1390_s24  }
   0x9   : > { %s49_s30 = ssub.s32 %s1031_s27, %s1103_s28  ;;  %p59_p0 = scmp.ne.s32.totalorder %s1027_s26, %s1023_s25 }
   0xa   : > { %p50_p1 = scmp.eq.s32.totalorder %s49_s30, 0  ;;  %p60_p2 = scmp.eq.s32.totalorder %s1031_s27, 0 }
   0xb   : > { %p820_p4 = scmp.lt.s32.totalorder %s1031_s27, 2  ;;  %s256_s9 = sand.u32 1, %s1031_s27  }
   0xc   : > { %s1114_s8 = scalar_select %p50_p1, %s1027_s26, %s52_s29  }
   0xd   : > { %p61_p5 = por %p60_p2, %p59_p0  ;;  %s258_s10 = sand.u32 1, %s1027_s26  }
   0xe   : > { %s1121_s11 = sshll.u32 %s258_s10, 4  ;;  %s749_s12 = sshll.u32 %s1031_s27, 6 }
   0xf   : > { %s1371_s1 = sld [smem:[#allocation12_spill]]  ;;  %s260_s16 = scalar_lea.vmem [#allocation5], %s1121_s11 }
  0x10   : > { %s266_s17 = sshll.u32 %s260_s16, 4  ;;  %p1132_p6 = pnand %p820_p4, %p61_p5  ;;  %s1136_s17 = int_to_ptr.vmem [resolvable:$true] %s266_s17 }
  0x11   : > { %s1138_s19 = scalar_lea.sflag [#allocation6], %s256_s9 }
  0x12   : > { %p875_p8 = pneg %p1132_p6 }
  0x15   : > { %s1129_s15 = scalar_lea.hbm %s1371_s1, %s749_s12  ;;  %s878_s23 = scalar_lea.hbm %s1371_s1, 512 }
  0x16   : > { %s873_s20 = scalar_lea.hbm %s1129_s15, 256  ;;  %p879_p11 = scmp.lt.u32.totalorder %s1129_s15, %s1371_s1 }
  0x17   : > { %p874_p7 = scmp.ne.s32.totalorder %s1129_s15, %s873_s20  ;;  %p880_p12 = scmp.lt.u32.totalorder %s878_s23, %s873_s20 }
  0x18   : > { %p882_p1 = scmp.lt.u32.totalorder %s873_s20, %s1129_s15 }
  0x19   : > { %p876_p9 = pnand %p875_p8, %p874_p7  ;;  %p881_p13 = por %p880_p12, %p879_p11 }
  0x1b   : > { %p877_p10 = pneg %p876_p9  ;;  %p883_p2 = por %p882_p1, %p881_p13 }
  0x1d   : > { %p884_p4 = pnand %p883_p2, %p877_p10 }
  0x1f   : > { %887 = shalt.err (!%p884_p4)
}
  0x20   : > { %s888_s9 = scalar_lea.vmem %s1136_s17, 256  ;;  %s1033_s10 = smov [#allocation5]  }
  0x21   : > { %p889_p5 = scmp.ne.s32.totalorder %s1136_s17, %s888_s9  ;;  %s893_s13 = sshll.u32 %s1033_s10, 4  ;;  %s894_s13 = int_to_ptr.vmem [resolvable:$false] %s893_s13 }
  0x22   : > { %s895_s14 = scalar_lea.vmem %s894_s13, 512  ;;  %p896_p3 = scmp.lt.s32.totalorder %s1136_s17, %s894_s13 }
  0x23   : > { %p891_p7 = pnand %p889_p5, %p875_p8  ;;  %p897_p11 = scmp.lt.s32.totalorder %s895_s14, %s888_s9 }
  0x25   : > { %p892_p9 = pneg %p891_p7  ;;  %p898_p12 = por %p897_p11, %p896_p3 }
  0x27   : > { %p899_p13 = pnand %p898_p12, %p892_p9 }
  0x29   : > { %902 = shalt.err (!%p899_p13)
}
  0x2a   : > { %s1363_s16 = smov 128   ;;  %s1364_s20 = smov 64  }
  0x2b   : > { %s1365_s21 = smov 4   ;;  %s1174_s29 = scalar_lea.hbm %s1357_s2, %s749_s12 }
  0x2c   : > { %811 = dma.hbm_to_vmem [thread:$0]  (!%p1132_p6), %s1129_s15, 256, %s1136_s17, %s1138_s19, %s1363_s16, %s1364_s20, %s1365_s21  }
  0x2d   : > { %s280_s30 = scalar_lea.vmem [#allocation7], %s1121_s11  ;;  %s1178_s10 = sadd.s32 4294967295, %s1031_s27  }
  0x2e   : > { %s286_s9 = sshll.u32 %s280_s30, 4  ;;  %s744_s13 = sadd.s32 4294967294, %s1031_s27   ;;  %s1204_s9 = int_to_ptr.vmem [resolvable:$true] %s286_s9 }
  0x2f   : > { %p65_p3 = scmp.ne.s32.totalorder %s1023_s25, %s1019_s24  ;;  %p1366_p10 = scmp.eq.s32.totalorder %s1178_s10, 0 }
  0x30   : > { %p219_p1 = scmp.eq.s32.totalorder %s1178_s10, 1  ;;  %p225_p2 = scmp.eq.s32.totalorder %s744_s13, 1 }
  0x31   : > { %p745_p4 = scmp.ge.s32.totalorder %s1031_s27, 1  ;;  %p1188_p5 = por %p1366_p10, %p65_p3 }
  0x32   : > { %p1195_p7 = por %p219_p1, %p59_p0  ;;  %p1199_p9 = por %p225_p2, %p65_p3 }
  0x33   : > { %s1373_s12 = scalar_select %p1188_p5, 1, 0 }
  0x34   : > { %s1374_s11 = scalar_select %p1195_p7, 1, 0 }
  0x35   : > { %s1375_s15 = scalar_select %p1199_p9, 1, 0 }
  0x36   : > { %p232_p11 = scmp.lt.s32.totalorder %s1031_s27, 3  ;;  %s1037_s14 = smov [#allocation2]  }
  0x37   : > { %s1210_s22 = sshll.u32 %s1037_s14, 4  ;;  %s903_s23 = scalar_lea.hbm %s1174_s29, 256  ;;  %s246_s22 = int_to_ptr.vmem [resolvable:$true] %s1210_s22 }
  0x38   : > { %p1206_p12 = pnand %p745_p4, %p232_p11  ;;  %p904_p13 = scmp.ne.s32.totalorder %s1174_s29, %s903_s23 }
  0x39   : > { %s908_s16 = scalar_lea.hbm %s1357_s2, 512  ;;  %p909_p2 = scmp.lt.u32.totalorder %s1174_s29, %s1357_s2 }
  0x3a   : > { %s1376_s17 = scalar_select %p1206_p12, 1, 0 }
  0x3b   : > { %p906_p3 = pnand %p904_p13, %p875_p8  ;;  %p910_p4 = scmp.lt.u32.totalorder %s908_s16, %s903_s23 }
  0x3c   : > { %p912_p10 = scmp.lt.u32.totalorder %s903_s23, %s1174_s29 }
  0x3d   : > { %p907_p1 = pneg %p906_p3  ;;  %p911_p11 = por %p910_p4, %p909_p2 }
  0x3f   : > { %p913_p9 = por %p912_p10, %p911_p11 }
  0x41   : > { %p914_p7 = pnand %p913_p9, %p907_p1 }
  0x43   : > { %917 = shalt.err (!%p914_p7)
}
  0x44   : > { %s918_s14 = scalar_lea.vmem %s1204_s9, 256  ;;  %s1038_s30 = smov [#allocation7]  }
  0x45   : > { %p919_p13 = scmp.ne.s32.totalorder %s1204_s9, %s918_s14  ;;  %s923_s13 = sshll.u32 %s1038_s30, 4  ;;  %s924_s13 = int_to_ptr.vmem [resolvable:$false] %s923_s13 }
  0x46   : > { %s925_s20 = scalar_lea.vmem %s924_s13, 512  ;;  %p926_p5 = scmp.lt.s32.totalorder %s1204_s9, %s924_s13 }
  0x47   : > { %p921_p3 = pnand %p919_p13, %p875_p8  ;;  %p927_p2 = scmp.lt.s32.totalorder %s925_s20, %s918_s14 }
  0x49   : > { %p922_p0 = pneg %p921_p3  ;;  %p928_p4 = por %p927_p2, %p926_p5 }
  0x4b   : > { %p929_p10 = pnand %p928_p4, %p922_p0 }
  0x4d   : > { %932 = shalt.err (!%p929_p10)
}
  0x4e   : > { %s1377_s16 = smov 4   ;;  %s1378_s21 = smov 64  }
  0x4f   : > { %s1379_s23 = smov 128   ;;  %p1380_p8 = scmp.eq.s32.totalorder %s1178_s10, 0 }
  0x50   : > { %814 = dma.hbm_to_vmem [thread:$0]  (!%p1132_p6), %s1174_s29, 256, %s1204_s9, %s1138_s19, %s1379_s23, %s1378_s21, %s1377_s16  }
  0x51   : > { %p1381_p7 = pneg %p1206_p12  ;;  %s933_s13 = scalar_lea.hbm %s1355_s0, 16 }
  0x52   : > { %p934_p5 = scmp.ne.s32.totalorder %s1355_s0, %s933_s13  ;;  %p940_p11 = scmp.lt.u32.totalorder %s933_s13, %s1355_s0 }
  0x53   : > { %p1247_p9 = pnand %p1381_p7, %p1380_p8 }
  0x55   : > { %p935_p0 = pneg %p1247_p9 }
  0x57   : > { %p936_p6 = pnand %p935_p0, %p934_p5 }
  0x59   : > { %p937_p1 = pneg %p936_p6 }
  0x5b   : > { %p942_p13 = pnand %p940_p11, %p937_p1 }
  0x5d   : > { %945 = shalt.err (!%p942_p13)
}
  0x5e   : > { %s946_s9 = scalar_lea.vmem %s246_s22, 16  ;;  %s953_s16 = scalar_lea.vmem %s246_s22, 32 }
  0x5f   : > { %p947_p3 = scmp.ne.s32.totalorder %s246_s22, %s946_s9  ;;  %p954_p10 = scmp.lt.s32.totalorder %s246_s22, %s246_s22 }
  0x60   : > { %p955_p8 = scmp.lt.s32.totalorder %s953_s16, %s946_s9 }
  0x61   : > { %p949_p2 = pnand %p947_p3, %p935_p0 }
  0x62   : > { %p956_p7 = por %p955_p8, %p954_p10 }
  0x63   : > { %p950_p4 = pneg %p949_p2 }
  0x65   : > { %p957_p12 = pnand %p956_p7, %p950_p4 }
  0x67   : > { %960 = shalt.err (!%p957_p12)
}
  0x68   : > { %807 = dma.hbm_to_vmem [thread:$0]  (!%p1247_p9), %s1355_s0, 16, %s246_s22, [#allocation3]  }
  0x69   : > { %p1383_p5 = scmp.ne.s32.totalorder %s1376_s17, 0 }
  0x6a   : > { %p1384_p6 = scmp.eq.s32.totalorder (!%p1383_p5), %s1178_s10, 0 }
  0x6b   : > { %322 = sbr.rel (%p1383_p5) target bundleno = 556 (0x22c), region = 48 }
  0x72   : > { %1006 = dma.done.wait (%p1384_p6), [#allocation3], 16   ;;  %p1385_p0 = pmov %p1384_p6 }
  0x73   : > { %s328_s23 = sand.u32 1, %s1178_s10   ;;  %s1275_s30 = sand.u32 1, %s1023_s25  }
  0x74   : > { %1008 = vsyncadd (%p1385_p0), [#allocation3], 4294967280  ;;  %s754_s14 = sshll.u32 %s1275_s30, 4  ;;  %s329_s18 = scalar_lea.sflag [#allocation6], %s328_s23 }
  0x75   : > { %s332_s13 = scalar_lea.vmem [#allocation5], %s754_s14  ;;  %p1386_p12 = scmp.ne.s32.totalorder %s1373_s12, 0 }
  0x77   : > { %1010 = dma.done.wait (%p1386_p12), %s329_s18, 512  }
  0x78   : > { %1012 = vsyncadd (%p1386_p12), %s329_s18, 4294966784  ;;  %v1039_v0 = vmov 0.0   ;;  %vm1040_vm0 = vmmov 0   ;;  %v861_v1 = vld [vmem:[%s332_s13] sm:$0xff]   ;;  %s341_s17 = scalar_lea.vmem [#allocation7], %s754_s14  ;;  %v863_v3 = vld [vmem:[%s332_s13 + $0x8] sm:$0xff]  }
  0x79   : > { %778 = vmatprep.subr.bf16.mxu0 %v1039_v0  ;;  %786 = vmatprep.subr.bf16.mxu1 %v1039_v0  ;;  %v862_v2 = vld [vmem:[%s341_s17] sm:$0xff]   ;;  %v864_v4 = vld [vmem:[%s341_s17 + $0x8] sm:$0xff]   ;;  %vm419_vm1 = vcmask 261120   ;;  %vm521_vm2 = vcmask 1041408   ;;  %p389_p9 = scmp.lt.s32.totalorder %s1178_s10, 1  ;;  %s756_s14 = sshll.u32 %s1275_s30, 1 }
  0x7a   : > { %782 = vmatprep.mubr.msk.bf16.mxu0 %vm1040_vm0, %v1039_v0  ;;  %790 = vmatprep.mubr.msk.bf16.mxu1 %vm1040_vm0, %v1039_v0  ;;  %v402_v5 = vld [vmem:[#allocation2] sm:$0x1]  ;;  %s769_s22 = sshll.u32 %s1178_s10, 5  ;;  %s388_s20 = scalar_lea.vmem [#allocation8], %s756_s14 }
  0x7b   : > { %779 = vmatpush3.bf16.msra.mxu0 %v861_v1  ;;  %787 = vmatpush3.bf16.msra.mxu1 %v862_v2  ;;  %s1288_s12 = scalar_select %p389_p9, %s1178_s10, 1 }
  0x7c   : > { %780 = vmatprep.subr.bf16.mxu0 %v1039_v0  ;;  %788 = vmatprep.subr.bf16.mxu1 %v1039_v0  ;;  %p1387_p11 = scmp.ne.s32.totalorder %s1374_s11, 0  ;;  %s1041_s10 = smov [#allocation8]  }
  0x7d   : > { %s397_s19 = scalar_lea.vmem %s1360_s5, %s1288_s12  ;;  %s400_s16 = scalar_lea.vmem %s1361_s6, %s1288_s12 }
  0x7e   : > { %v765_v36 = vld [vmem:[%s397_s19] ss:$0 sm:$0xff]  ;;  %s391_s23 = scalar_lea.vmem %s1358_s3, %s1288_s12  ;;  %s394_s17 = scalar_lea.vmem %s1359_s4, %s1288_s12 }
  0x7f   : > { %781 = vmatpush3.bf16.msra.mxu0 %v863_v3  ;;  %789 = vmatpush3.bf16.msra.mxu1 %v864_v4  ;;  %v766_v38 = vld [vmem:[%s400_s16] ss:$0 sm:$0xff]  ;;  %s606_s19 = sshll.u32 %s388_s20, 4  ;;  %s1311_s16 = scalar_lea.hbm %s1362_s7, %s769_s22  ;;  %s1313_s19 = int_to_ptr.vmem [resolvable:$true] %s606_s19 }
  0x80   : > { %v763_v49 = vld [vmem:[%s391_s23] ss:$0 sm:$0xff]  ;;  %s593_s12 = scalar_lea.sflag [#allocation4], %s1275_s30  ;;  %s961_s1 = scalar_lea.vmem %s1313_s19, 32 }
  0x81   : > { %v764_v51 = vld [vmem:[%s394_s17] ss:$0 sm:$0xff]  ;;  %p962_p1 = scmp.ne.s32.totalorder %s1313_s19, %s961_s1  ;;  %s965_s21 = sshll.u32 %s1041_s10, 4  ;;  %s966_s21 = int_to_ptr.vmem [resolvable:$false] %s965_s21 }
  0x82   : > { %783 = vmatmul.mubr.msk.bf16.vlgmr.msra.gmra.mrb[0].mxu0 %vm419_vm1, %v402_v5  ;;  %791 = vmatmul.mubr.msk.bf16.vlgmr.msra.gmra.mrb[0].mxu1 %vm419_vm1, %v402_v5  ;;  %s967_s23 = scalar_lea.vmem %s966_s21, 64  ;;  %p968_p2 = scmp.lt.s32.totalorder %s1313_s19, %s966_s21 }
  0x83   : > { %p963_p13 = pnand %p962_p1, %p1387_p11  ;;  %p969_p4 = scmp.lt.s32.totalorder %s967_s23, %s961_s1 }
  0x85   : > { %p964_p3 = pneg %p963_p13  ;;  %p970_p10 = por %p969_p4, %p968_p2 }
  0x87   : > { %p971_p8 = pnand %p970_p10, %p964_p3 }
 0x155   : > { %v457_v6 = vpop.f32.mrb[0].mxu0  ;;  %v513_v7 = vpop.f32.mrb[0].mxu1 }
 0x156   : > { %v522_v8 = vsel %vm521_vm2, %v457_v6, 0.0  ;;  %v526_v9 = vmul.f32 %v457_v6, %v457_v6  ;;  %v784_v10 = vpop.f32.mrb[1].mxu0  ;;  %v792_v11 = vpop.f32.mrb[1].mxu1  ;;  %v554_v12 = vsel %vm521_vm2, %v513_v7, 0.0  ;;  %v558_v13 = vmul.f32 %v513_v7, %v513_v7 }
 0x157   : > { %523 = vadd.xlane.f32.xlu1 %v522_v8  ;;  %v460_v14 = vpop.f32.mrb[2].mxu0  ;;  %555 = vadd.xlane.f32.xlu0 %v554_v12  ;;  %v516_v15 = vpop.f32.mrb[2].mxu1 }
 0x158   : > { %v527_v16 = vsel %vm521_vm2, %v526_v9, 0.0  ;;  %v785_v17 = vpop.f32.mrb[3].mxu0  ;;  %v793_v18 = vpop.f32.mrb[3].mxu1  ;;  %v559_v19 = vsel %vm521_vm2, %v558_v13, 0.0 }
 0x15b   : > { %528 = vadd.xlane.f32.xlu1 %v527_v16  ;;  %560 = vadd.xlane.f32.xlu0 %v559_v19 }
 0x1e4   : > { %v556_v20 = vpop.xlane.xlu0 %555  ;;  %v524_v26 = vpop.xlane.xlu1 %523 }
 0x1e5   : > { %v557_v21 = vmul.f32 0.0078125, %v556_v20  ;;  %v525_v30 = vmul.f32 0.0078125, %v524_v26 }
 0x1e7   : > { %v563_v23 = vmul.f32 %v557_v21, %v557_v21  ;;  %v531_v31 = vmul.f32 %v525_v30, %v525_v30  ;;  %v566_v34 = vsub.f32 %v513_v7, %v557_v21  ;;  %v534_v47 = vsub.f32 %v457_v6, %v525_v30 }
 0x1e8   : > { %v561_v22 = vpop.xlane.xlu0 %560  ;;  %v529_v29 = vpop.xlane.xlu1 %528 }
 0x1e9   : > { %v562_v24 = vmul.f32 0.0078125, %v561_v22  ;;  %v530_v32 = vmul.f32 0.0078125, %v529_v29 }
 0x1eb   : > { %v564_v25 = vsub.f32 %v562_v24, %v563_v23  ;;  %v532_v33 = vsub.f32 %v530_v32, %v531_v31 }
 0x1ed   : > { %v565_v27 = vmax.f32 %v564_v25, 0.0  ;;  %v533_v39 = vmax.f32 %v532_v33, 0.0 }
 0x1ef   : > { %v567_v28 = vadd.f32 1e-05, %v565_v27  ;;  %v535_v42 = vadd.f32 1e-05, %v533_v39 }
 0x1f1   : > { %865 = vrsqrt.f32 %v567_v28 }
 0x1fb   : > { %v866_v35 = vpop.eup %865 }
 0x1fc   : > { %v569_v37 = vmul.f32 %v866_v35, %v566_v34 }
 0x1fe   : > { %v576_v40 = vmul.f32 %v765_v36, %v569_v37 }
 0x200   : > { %v583_v41 = vadd.f32 %v766_v38, %v576_v40 }
 0x202   : > { %v767_v43 = vmul.f32 -1.442695, %v583_v41 }
 0x204   : > { %867 = vpow2.f32 %v767_v43 }
 0x205   : > { %869 = vrsqrt.f32 %v535_v42 }
 0x20e   : > { %v868_v44 = vpop.eup %867 }
 0x20f   : > { %v870_v45 = vpop.eup %869  ;;  %v587_v46 = vadd.f32 1.0, %v868_v44 }
 0x210   : > { %v537_v48 = vmul.f32 %v870_v45, %v534_v47 }
 0x211   : > { %871 = vrcp.f32 %v587_v46 }
 0x212   : > { %v544_v50 = vmul.f32 %v763_v49, %v537_v48 }
 0x214   : > { %v551_v52 = vadd.f32 %v764_v51, %v544_v50 }
 0x21b   : > { %v872_v53 = vpop.eup %871 }
 0x21c   : > { %v590_v54 = vmul.f32 %v872_v53, %v551_v52 }
 0x21e   : > { %591 = vst [vmem:[%s388_s20] sm:$0x3] %v590_v54 }
 0x21f   : > { %974 = shalt.err (!%p971_p8)
}
 0x220   : > { %s975_s30 = scalar_lea.hbm %s1311_s16, 32  ;;  %s979_s13 = scalar_lea.hbm %s1362_s7, 64 }
 0x221   : > { %p976_p7 = scmp.ne.s32.totalorder %s1311_s16, %s975_s30  ;;  %p980_p0 = scmp.lt.u32.totalorder %s1311_s16, %s1362_s7 }
 0x222   : > { %p981_p12 = scmp.lt.u32.totalorder %s979_s13, %s975_s30  ;;  %p983_p1 = scmp.lt.u32.totalorder %s975_s30, %s1311_s16 }
 0x223   : > { %p977_p5 = pnand %p976_p7, %p1387_p11 }
 0x224   : > { %p982_p9 = por %p981_p12, %p980_p0 }
 0x225   : > { %p978_p6 = pneg %p977_p5 }
 0x226   : > { %p984_p13 = por %p983_p1, %p982_p9 }
 0x228   : > { %p985_p3 = pnand %p984_p13, %p978_p6 }
 0x22a   : > { %988 = shalt.err (!%p985_p3)
}
 0x22b   : > { %802 = dma.vmem_to_hbm [thread:$0]  (%p1387_p11), %s1313_s19, 32, %s1311_s16, %s593_s12  }
 0x22c PF: > { %s618_s20 = sand.u32 1, %s1019_s24   ;;  %p1388_p2 = scmp.ne.s32.totalorder %s1375_s15, 0 }
 0x22d   : > { %p1389_p4 = scmp.ge.s32.totalorder %s1031_s27, 2  ;;  %s619_s29 = scalar_lea.sflag [#allocation4], %s618_s20 }
 0x22f   : > { %p816_p10 = pnand %p1389_p4, %p1388_p2 }
 0x231   : > { %1014 = dma.done.wait (!%p816_p10), %s619_s29, 32  }
 0x232   : > { %1016 = vsyncadd (!%p816_p10), %s619_s29, 4294967264  ;;  %p21_p8 = scmp.ge.s32.totalorder %s1103_s28, 4   ;;  %s1390_s24 = smov %s1023_s25 }
 0x233   : > { %s1391_s25 = smov %s1027_s26  ;;  %s1392_s26 = smov %s1114_s8 }
 0x234   : > { %s1393_s27 = smov %s1103_s28  ;;  %23 = sbr.rel (!%p21_p8) target bundleno = 8 (0x8), region = 121 }
 0x23b   :  { %624 = vsyncpa [#allocation3], 1 }
 0x23c   :  { %626 = vsyncpa [#allocation3 + $0x1], 1 }
 0x23d   :  { %627 = vsyncpa [#allocation6], 1 }
 0x23e   :  { %629 = vsyncpa [#allocation6 + $0x1], 1 }
 0x23f   :  { %630 = vsyncpa [#allocation4], 1 }
 0x240   :  { %632 = vsyncpa [#allocation4 + $0x1], 1 }

</bundles_post_ra>
